<compile_context>
chip_gen: v7x
topology: tpu7x:2x2x1
jax: 0.10.0
libtpu: 0.0.40
codegen_flags: <defaults>
</compile_context>

<pallas_src>
import functools

import jax
import jax.numpy as jnp
import numpy as np
from jax import lax
from jax.experimental import pallas as pl
from jax.experimental.pallas import tpu as pltpu

EPS = 1e-5                     # nn.BatchNorm2d default eps
LANE = 128                     # lane width, used only for VMEM footprint estimates
VMEM_BUDGET = 6 << 20          # per-call double-buffered working-set target (fits v5e's 16 MiB scoped default)
VMEM_LIMIT = 32 * 1024 * 1024  # explicit scoped-VMEM ceiling, safe on v5e / v6e / v7x


def _round_up(x, m):
    return ((x + m - 1) // m) * m


def _pick_tile(total_rows, per_row_bytes, *, align, budget_bytes=VMEM_BUDGET):
    """Largest divisor of `total_rows` that is a multiple of `align` and keeps the
    double-buffered footprint under `budget_bytes`; falls back to the full extent."""
    max_rows = max(align, budget_bytes // (2 * per_row_bytes))
    if total_rows <= max_rows:
        return total_rows
    best = None
    d = align
    while d <= max_rows:
        if total_rows % d == 0:
            best = d
        d += align
    return best if best is not None else total_rows


# ----------------------- pass 1: conv matmul -> BN partial stats only -----------------------
def _conv_stats_kernel(x_ref, w_ref, stat_ref):
    # x_ref: (1, THW, K) bf16      w_ref: (K, Cout) bf16 (resident: constant index_map)
    y = jnp.dot(x_ref[0], w_ref[...], preferred_element_type=jnp.float32)   # (THW, Cout) f32
    s = jnp.sum(y, axis=0, keepdims=True)                                    # (1, Cout)
    ss = jnp.sum(y * y, axis=0, keepdims=True)                               # (1, Cout)
    pad = jnp.zeros((6, y.shape[1]), jnp.float32)                            # sublane padding rows
    stat_ref[0, 0] = jnp.concatenate([s, ss, pad], axis=0)                   # (8, Cout) full-tile store


# ----------------- pass 2: conv (recomputed) + BN affine + MaxPool2d(2) + ReLU ----------------
def _conv_bn_relu_pool_kernel(x_ref, w_ref, scale_ref, shift_ref, o_ref):
    # x_ref: (1, 4, TQ, K) bf16 -- 4 pool phases x TQ pooled pixels of im2col rows
    w = w_ref[...]                          # (K, Cout) bf16
    sc = scale_ref[...]                     # (1, Cout) f32

    def phase(p):
        # scale per phase (gamma may be negative, so scaling must precede the max)
        return jnp.dot(x_ref[0, p], w, preferred_element_type=jnp.float32) * sc

    m = jnp.maximum(jnp.maximum(phase(0), phase(1)),
                    jnp.maximum(phase(2), phase(3)))        # 2x2 max pool: elementwise max
    # shift commutes with max; ReLU is monotone and commutes with the pool
    o_ref[0] = jnp.maximum(m + shift_ref[...], 0.0)


@functools.partial(jax.jit, static_argnames=("tile_hw", "tile_q"))
def cnn_layer_forward(x_nchw, w_oihw, bias, gamma, beta, *, tile_hw=None, tile_q=None):
    del bias  # exactly cancelled by training-mode BatchNorm -> dead compute / dead DMA
    N, Cin, H, W = x_nchw.shape
    Cout = w_oihw.shape[0]
    assert H % 2 == 0 and W % 2 == 0
    Ho, Wo = H // 2, W // 2
    HW, Q = H * W, Ho * Wo
    K = 9 * Cin                              # fused contraction: one K=9*Cin matmul per row

    # ---- wrapper-side im2col in bf16: 9 shifted views -> one fused K axis, rows permuted into
    #      2x2-pool-phase-major order so the pool is an elementwise max of 4 phase slabs ----
    # TODO(synk): building the 9 taps inside the kernel from a halo'd NHWC tile would cut the
    #             x_taps HBM stream by up to ~9x; bf16 already halves it.
    x = jnp.transpose(x_nchw, (0, 2, 3, 1)).astype(jnp.bfloat16)             # NHWC
    xp = jnp.pad(x, ((0, 0), (1, 1), (1, 1), (0, 0)))
    taps = jnp.stack([xp[:, kh:kh + H, kw:kw + W, :]
                      for kh in range(3) for kw in range(3)], axis=3)        # (N, H, W, 9, Cin)
    taps = taps.reshape(N, Ho, 2, Wo, 2, K)
    x_phases = taps.transpose(0, 2, 4, 1, 3, 5).reshape(N, 4, Q, K)          # phase-major rows
    x_taps = x_phases.reshape(N, HW, K)                                      # free view for pass 1

    # OIHW -> (9*Cin, Cout) with matching (kh, kw, cin) ordering; no channel padding
    w_mat = jnp.transpose(w_oihw, (2, 3, 1, 0)).reshape(K, Cout).astype(jnp.bfloat16)

    # ---- per-generation-safe tile sizing: double-buffered working set under ~6 MiB ----
    kb = _round_up(K, LANE) * 2              # one lane-padded bf16 im2col row
    cb = _round_up(Cout, LANE) * 4           # one lane-padded f32 channel row
    if tile_hw is None:
        tile_hw = _pick_tile(HW, kb + cb, align=16)            # bf16 sublanes -> multiple of 16
    if tile_q is None:
        tile_q = _pick_tile(Q, 4 * kb + 5 * cb, align=16)
    assert HW % tile_hw == 0 and Q % tile_q == 0
    n_hw_tiles = HW // tile_hw
    n_q_tiles = Q // tile_q

    cparams = pltpu.CompilerParams(
        dimension_semantics=("parallel", "parallel"),
        vmem_limit_bytes=VMEM_LIMIT)

    # ---- pass 1: per-tile channel partial sums (no conv activations hit HBM) ----
    part = pl.pallas_call(
        _conv_stats_kernel,
        grid=(N, n_hw_tiles),
        in_specs=[
            pl.BlockSpec((1, tile_hw, K), lambda n, t: (n, t, 0)),
            pl.BlockSpec((K, Cout), lambda n, t: (0, 0)),
        ],
        out_specs=pl.BlockSpec((1, 1, 8, Cout), lambda n, t: (n, t, 0, 0)),
        out_shape=jax.ShapeDtypeStruct((N, n_hw_tiles, 8, Cout), jnp.float32),
        compiler_params=cparams,
    )(x_taps, w_mat)

    # ---- global BatchNorm training statistics (biased variance) from the tiny partials ----
    cnt = float(N * HW)
    mean = jnp.sum(part[:, :, 0, :], axis=(0, 1)) / cnt
    var = jnp.maximum(jnp.sum(part[:, :, 1, :], axis=(0, 1)) / cnt - mean * mean, 0.0)
    gamma_f = gamma.astype(jnp.float32)
    beta_f = beta.astype(jnp.float32)
    rs = lax.rsqrt(var + EPS)
    scale = (gamma_f * rs).reshape(1, Cout)
    shift = (beta_f - mean * gamma_f * rs).reshape(1, Cout)

    # ---- pass 2: recompute conv per pool phase, normalize, pool, ReLU ----
    out = pl.pallas_call(
        _conv_bn_relu_pool_kernel,
        grid=(N, n_q_tiles),
        in_specs=[
            pl.BlockSpec((1, 4, tile_q, K), lambda n, t: (n, 0, t, 0)),
            pl.BlockSpec((K, Cout), lambda n, t: (0, 0)),
            pl.BlockSpec((1, Cout), lambda n, t: (0, 0)),
            pl.BlockSpec((1, Cout), lambda n, t: (0, 0)),
        ],
        out_specs=pl.BlockSpec((1, tile_q, Cout), lambda n, t: (n, t, 0)),
        out_shape=jax.ShapeDtypeStruct((N, Q, Cout), jnp.float32),
        compiler_params=cparams,
    )(x_phases, w_mat, scale, shift)

    # (N, Ho*Wo, Cout) -> NCHW (tiny copy: only the real Cout channels exist)
    return jnp.transpose(out.reshape(N, Ho, Wo, Cout), (0, 3, 1, 2))


def _ref_forward(x_nchw, w_oihw, bias, gamma, beta):
    y = lax.conv_general_dilated(
        x_nchw, w_oihw, window_strides=(1, 1), padding=((1, 1), (1, 1)),
        dimension_numbers=('NCHW', 'OIHW', 'NCHW'),
        precision=lax.Precision.HIGHEST)
    y = y + bias[None, :, None, None]
    mean = jnp.mean(y, axis=(0, 2, 3), keepdims=True)
    var = jnp.var(y, axis=(0, 2, 3), keepdims=True)   # biased var, as BN uses in training
    y = (y - mean) * lax.rsqrt(var + EPS)
    y = y * gamma[None, :, None, None] + beta[None, :, None, None]
    y = jnp.maximum(y, 0.0)
    N, C, H, W = y.shape
    return y.reshape(N, C, H // 2, 2, W // 2, 2).max(axis=(3, 5))


if __name__ == "__main__":
    N, Cin, Cout, H, W = 2, 4, 8, 16, 16
    key = jax.random.PRNGKey(0)
    kx, kw, kb, kg, kbe = jax.random.split(key, 5)

    x = jax.random.normal(kx, (N, Cin, H, W), jnp.float32)
    bound = 1.0 / np.sqrt(Cin * 9)                       # kaiming-uniform-ish, deterministic
    w = jax.random.uniform(kw, (Cout, Cin, 3, 3), jnp.float32, -bound, bound)
    b = jax.random.uniform(kb, (Cout,), jnp.float32, -bound, bound)
    gamma = 1.0 + 0.1 * jax.random.normal(kg, (Cout,), jnp.float32)
    beta = 0.1 * jax.random.normal(kbe, (Cout,), jnp.float32)

    # small explicit tiles so the (batch, spatial-tile) grid is exercised at toy shapes
    out = jax.block_until_ready(
        cnn_layer_forward(x, w, b, gamma, beta, tile_hw=64, tile_q=16))
    ref = jax.block_until_ready(_ref_forward(x, w, b, gamma, beta))
    assert out.shape == (N, Cout, H // 2, W // 2)
    np.testing.assert_allclose(np.asarray(out), np.asarray(ref), rtol=2e-2, atol=2e-2)
    print("KERNEL_OK")
</pallas_src>

<mosaic_0001>
module attributes {stable_mosaic.version = 11 : i64} {
  func.func @_conv_stats_kernel(%arg0: i32, %arg1: i32, %arg2: memref<1x64x36xbf16, #tpu.memory_space<vmem>>, %arg3: memref<36x8xbf16, #tpu.memory_space<vmem>>, %arg4: memref<1x1x8x8xf32, #tpu.memory_space<vmem>>) attributes {dimension_semantics = [#tpu.dimension_semantics<parallel>, #tpu.dimension_semantics<parallel>], iteration_bounds = array<i64: 2, 4>, scalar_prefetch = 0 : i64, scratch_operands = 0 : i64, tpu.core_type = #tpu.core_type<tc>, window_params = [{transform_indices = @transform_0, window_bounds = array<i64: 1, 64, 36>}, {pipeline_mode = #tpu.pipeline_mode<synchronous>, transform_indices = @transform_1, window_bounds = array<i64: 36, 8>}, {transform_indices = @transform_2, window_bounds = array<i64: 1, 1, 8, 8>}]} {
    %c0 = arith.constant 0 : index
    %c0_0 = arith.constant 0 : index
    %c0_1 = arith.constant 0 : index
    %0 = vector.load %arg2[%c0, %c0_0, %c0_1] : memref<1x64x36xbf16, #tpu.memory_space<vmem>>, vector<1x64x36xbf16>
    %1 = vector.shape_cast %0 : vector<1x64x36xbf16> to vector<64x36xbf16>
    %c0_2 = arith.constant 0 : index
    %c0_3 = arith.constant 0 : index
    %2 = vector.load %arg3[%c0_2, %c0_3] : memref<36x8xbf16, #tpu.memory_space<vmem>>, vector<36x8xbf16>
    %cst = arith.constant dense<0.000000e+00> : vector<64x8xf32>
    %3 = tpu.matmul %1, %2, %cst {dimension_numbers = #tpu.dot_dimension_numbers<[1], [0], [0], [1], [0, 0, 1, 1], [], []>} : vector<64x36xbf16>, vector<36x8xbf16>, vector<64x8xf32> -> vector<64x8xf32>
    %cst_4 = arith.constant dense<0.000000e+00> : vector<8xf32>
    %4 = vector.multi_reduction <add>, %3, %cst_4 [0] : vector<64x8xf32> to vector<8xf32>
    %5 = vector.shape_cast %4 : vector<8xf32> to vector<1x8xf32>
    %6 = arith.mulf %3, %3 : vector<64x8xf32>
    %cst_5 = arith.constant dense<0.000000e+00> : vector<8xf32>
    %7 = vector.multi_reduction <add>, %6, %cst_5 [0] : vector<64x8xf32> to vector<8xf32>
    %8 = vector.shape_cast %7 : vector<8xf32> to vector<1x8xf32>
    %cst_6 = arith.constant 0.000000e+00 : f32
    %9 = vector.broadcast %cst_6 : f32 to vector<6x8xf32>
    %10 = tpu.concatenate %5, %8, %9 in 0 : vector<1x8xf32>, vector<1x8xf32>, vector<6x8xf32> -> vector<8x8xf32>
    %c0_7 = arith.constant 0 : index
    %c0_8 = arith.constant 0 : index
    %c0_9 = arith.constant 0 : index
    %c0_10 = arith.constant 0 : index
    %11 = vector.load %arg4[%c0_7, %c0_8, %c0_9, %c0_10] : memref<1x1x8x8xf32, #tpu.memory_space<vmem>>, vector<1x1x8x8xf32>
    %12 = vector.shape_cast %11 : vector<1x1x8x8xf32> to vector<8x8xf32>
    %13 = vector.shape_cast %10 : vector<8x8xf32> to vector<1x1x8x8xf32>
    tpu.vector_store %arg4[%c0_7, %c0_8, %c0_9, %c0_10], %13 {strides = array<i32>} : memref<1x1x8x8xf32, #tpu.memory_space<vmem>>, vector<1x1x8x8xf32>,
    return
  }
  func.func @transform_0(%arg0: i32, %arg1: i32) -> (i32, i32, i32) {
    %c0_i32 = arith.constant 0 : i32
    %c0_i32_0 = arith.constant 0 : i32
    return %arg0, %arg1, %c0_i32 : i32, i32, i32
  }
  func.func @transform_1(%arg0: i32, %arg1: i32) -> (i32, i32) {
    %c0_i32 = arith.constant 0 : i32
    %c0_i32_0 = arith.constant 0 : i32
    %c0_i32_1 = arith.constant 0 : i32
    return %c0_i32, %c0_i32_0 : i32, i32
  }
  func.func @transform_2(%arg0: i32, %arg1: i32) -> (i32, i32, i32, i32) {
    %c0_i32 = arith.constant 0 : i32
    %c0_i32_0 = arith.constant 0 : i32
    %c0_i32_1 = arith.constant 0 : i32
    return %arg0, %arg1, %c0_i32, %c0_i32_0 : i32, i32, i32, i32
  }
}

module attributes {stable_mosaic.version = 11 : i64} {
  func.func @_conv_bn_relu_pool_kernel(%arg0: i32, %arg1: i32, %arg2: memref<1x4x16x36xbf16, #tpu.memory_space<vmem>>, %arg3: memref<36x8xbf16, #tpu.memory_space<vmem>>, %arg4: memref<1x8xf32, #tpu.memory_space<vmem>>, %arg5: memref<1x8xf32, #tpu.memory_space<vmem>>, %arg6: memref<1x16x8xf32, #tpu.memory_space<vmem>>) attributes {dimension_semantics = [#tpu.dimension_semantics<parallel>, #tpu.dimension_semantics<parallel>], iteration_bounds = array<i64: 2, 4>, scalar_prefetch = 0 : i64, scratch_operands = 0 : i64, tpu.core_type = #tpu.core_type<tc>, window_params = [{transform_indices = @transform_0, window_bounds = array<i64: 1, 4, 16, 36>}, {pipeline_mode = #tpu.pipeline_mode<synchronous>, transform_indices = @transform_1, window_bounds = array<i64: 36, 8>}, {pipeline_mode = #tpu.pipeline_mode<synchronous>, transform_indices = @transform_2, window_bounds = array<i64: 1, 8>}, {pipeline_mode = #tpu.pipeline_mode<synchronous>, transform_indices = @transform_3, window_bounds = array<i64: 1, 8>}, {transform_indices = @transform_4, window_bounds = array<i64: 1, 16, 8>}]} {
    %c0 = arith.constant 0 : index
    %c0_0 = arith.constant 0 : index
    %0 = vector.load %arg3[%c0, %c0_0] : memref<36x8xbf16, #tpu.memory_space<vmem>>, vector<36x8xbf16>
    %c0_1 = arith.constant 0 : index
    %c0_2 = arith.constant 0 : index
    %1 = vector.load %arg4[%c0_1, %c0_2] : memref<1x8xf32, #tpu.memory_space<vmem>>, vector<1x8xf32>
    %c0_3 = arith.constant 0 : index
    %c0_4 = arith.constant 0 : index
    %c0_5 = arith.constant 0 : index
    %c0_6 = arith.constant 0 : index
    %2 = vector.load %arg2[%c0_3, %c0_4, %c0_5, %c0_6] : memref<1x4x16x36xbf16, #tpu.memory_space<vmem>>, vector<1x1x16x36xbf16>
    %3 = vector.shape_cast %2 : vector<1x1x16x36xbf16> to vector<16x36xbf16>
    %cst = arith.constant dense<0.000000e+00> : vector<16x8xf32>
    %4 = tpu.matmul %3, %0, %cst {dimension_numbers = #tpu.dot_dimension_numbers<[1], [0], [0], [1], [0, 0, 1, 1], [], []>} : vector<16x36xbf16>, vector<36x8xbf16>, vector<16x8xf32> -> vector<16x8xf32>
    %5 = vector.broadcast %1 : vector<1x8xf32> to vector<16x8xf32>
    %6 = arith.mulf %4, %5 : vector<16x8xf32>
    %c0_7 = arith.constant 0 : index
    %c1 = arith.constant 1 : index
    %c0_8 = arith.constant 0 : index
    %c0_9 = arith.constant 0 : index
    %7 = vector.load %arg2[%c0_7, %c1, %c0_8, %c0_9] : memref<1x4x16x36xbf16, #tpu.memory_space<vmem>>, vector<1x1x16x36xbf16>
    %8 = vector.shape_cast %7 : vector<1x1x16x36xbf16> to vector<16x36xbf16>
    %cst_10 = arith.constant dense<0.000000e+00> : vector<16x8xf32>
    %9 = tpu.matmul %8, %0, %cst_10 {dimension_numbers = #tpu.dot_dimension_numbers<[1], [0], [0], [1], [0, 0, 1, 1], [], []>} : vector<16x36xbf16>, vector<36x8xbf16>, vector<16x8xf32> -> vector<16x8xf32>
    %10 = vector.broadcast %1 : vector<1x8xf32> to vector<16x8xf32>
    %11 = arith.mulf %9, %10 : vector<16x8xf32>
    %12 = arith.maximumf %6, %11 : vector<16x8xf32>
    %c0_11 = arith.constant 0 : index
    %c2 = arith.constant 2 : index
    %c0_12 = arith.constant 0 : index
    %c0_13 = arith.constant 0 : index
    %13 = vector.load %arg2[%c0_11, %c2, %c0_12, %c0_13] : memref<1x4x16x36xbf16, #tpu.memory_space<vmem>>, vector<1x1x16x36xbf16>
    %14 = vector.shape_cast %13 : vector<1x1x16x36xbf16> to vector<16x36xbf16>
    %cst_14 = arith.constant dense<0.000000e+00> : vector<16x8xf32>
    %15 = tpu.matmul %14, %0, %cst_14 {dimension_numbers = #tpu.dot_dimension_numbers<[1], [0], [0], [1], [0, 0, 1, 1], [], []>} : vector<16x36xbf16>, vector<36x8xbf16>, vector<16x8xf32> -> vector<16x8xf32>
    %16 = vector.broadcast %1 : vector<1x8xf32> to vector<16x8xf32>
    %17 = arith.mulf %15, %16 : vector<16x8xf32>
    %c0_15 = arith.constant 0 : index
    %c3 = arith.constant 3 : index
    %c0_16 = arith.constant 0 : index
    %c0_17 = arith.constant 0 : index
    %18 = vector.load %arg2[%c0_15, %c3, %c0_16, %c0_17] : memref<1x4x16x36xbf16, #tpu.memory_space<vmem>>, vector<1x1x16x36xbf16>
    %19 = vector.shape_cast %18 : vector<1x1x16x36xbf16> to vector<16x36xbf16>
    %cst_18 = arith.constant dense<0.000000e+00> : vector<16x8xf32>
    %20 = tpu.matmul %19, %0, %cst_18 {dimension_numbers = #tpu.dot_dimension_numbers<[1], [0], [0], [1], [0, 0, 1, 1], [], []>} : vector<16x36xbf16>, vector<36x8xbf16>, vector<16x8xf32> -> vector<16x8xf32>
    %21 = vector.broadcast %1 : vector<1x8xf32> to vector<16x8xf32>
    %22 = arith.mulf %20, %21 : vector<16x8xf32>
    %23 = arith.maximumf %17, %22 : vector<16x8xf32>
    %24 = arith.maximumf %12, %23 : vector<16x8xf32>
    %c0_19 = arith.constant 0 : index
    %c0_20 = arith.constant 0 : index
    %25 = vector.load %arg5[%c0_19, %c0_20] : memref<1x8xf32, #tpu.memory_space<vmem>>, vector<1x8xf32>
    %26 = vector.broadcast %25 : vector<1x8xf32> to vector<16x8xf32>
    %27 = arith.addf %24, %26 : vector<16x8xf32>
    %cst_21 = arith.constant 0.000000e+00 : f32
    %28 = vector.broadcast %cst_21 : f32 to vector<16x8xf32>
    %29 = arith.maximumf %27, %28 : vector<16x8xf32>
    %c0_22 = arith.constant 0 : index
    %c0_23 = arith.constant 0 : index
    %c0_24 = arith.constant 0 : index
    %30 = vector.load %arg6[%c0_22, %c0_23, %c0_24] : memref<1x16x8xf32, #tpu.memory_space<vmem>>, vector<1x16x8xf32>
    %31 = vector.shape_cast %30 : vector<1x16x8xf32> to vector<16x8xf32>
    %32 = vector.shape_cast %29 : vector<16x8xf32> to vector<1x16x8xf32>
    tpu.vector_store %arg6[%c0_22, %c0_23, %c0_24], %32 {strides = array<i32>} : memref<1x16x8xf32, #tpu.memory_space<vmem>>, vector<1x16x8xf32>,
    return
  }
  func.func @transform_0(%arg0: i32, %arg1: i32) -> (i32, i32, i32, i32) {
    %c0_i32 = arith.constant 0 : i32
    %c0_i32_0 = arith.constant 0 : i32
    %c0_i32_1 = arith.constant 0 : i32
    return %arg0, %c0_i32, %arg1, %c0_i32_0 : i32, i32, i32, i32
  }
  func.func @transform_1(%arg0: i32, %arg1: i32) -> (i32, i32) {
    %c0_i32 = arith.constant 0 : i32
    %c0_i32_0 = arith.constant 0 : i32
    %c0_i32_1 = arith.constant 0 : i32
    return %c0_i32, %c0_i32_0 : i32, i32
  }
  func.func @transform_2(%arg0: i32, %arg1: i32) -> (i32, i32) {
    %c0_i32 = arith.constant 0 : i32
    %c0_i32_0 = arith.constant 0 : i32
    %c0_i32_1 = arith.constant 0 : i32
    return %c0_i32, %c0_i32_0 : i32, i32
  }
  func.func @transform_3(%arg0: i32, %arg1: i32) -> (i32, i32) {
    %c0_i32 = arith.constant 0 : i32
    %c0_i32_0 = arith.constant 0 : i32
    %c0_i32_1 = arith.constant 0 : i32
    return %c0_i32, %c0_i32_0 : i32, i32
  }
  func.func @transform_4(%arg0: i32, %arg1: i32) -> (i32, i32, i32) {
    %c0_i32 = arith.constant 0 : i32
    %c0_i32_0 = arith.constant 0 : i32
    return %arg0, %arg1, %c0_i32 : i32, i32, i32
  }
}

</mosaic_0001>

<bundles_post_ra>
// kernel: cnn_layer_forward.2
= control target key start
LH: loop header
LB: loop body
LE: loop exit
PB: predicated region body
PF: predicated region fallthrough
CT: control target
= control target key end

     0   :  { %s606_s9 = smov 0   ;;  %s608_s10 = smov 0   ;;  %s696_s0 = inlined_call_operand.vmem [shape: bf16[2,256,36], index: 0, kind: input, shape index: {}]   ;;  %s697_s1 = inlined_call_operand.vmem [shape: bf16[36,8], index: 1, kind: input, shape index: {}]   ;;  %s698_s2 = inlined_call_operand.vmem [shape: f32[2,4,8,8], index: 2, kind: output, shape index: {}]  }
   0x1   :  { %s610_s11 = smov 0   ;;  %s612_s12 = smov 0  }
   0x2   :  { %s614_s13 = smov 0  }
   0x3 LB: > { %s21_s14 = sadd.s32 1, %s581_s11  ;;  %s24_s15 = sadd.s32 1, %s585_s12  ;;  %s589_s13 = sphi %s614_s13, %s12_s13   ;;  %s585_s12 = sphi %s612_s12, %s702_s12   ;;  %s581_s11 = sphi %s610_s11, %s701_s11   ;;  %s577_s10 = sphi %s608_s10, %s700_s10   ;;  %s573_s9 = sphi %s606_s9, %s699_s9  }
   0x4   : > { %p22_p0 = scmp.ge.s32.totalorder %s21_s14, 4  ;;  %p456_p1 = scmp.ge.s32.totalorder %s589_s13, 1 }
   0x5   : > { %p133_p2 = scmp.lt.s32.totalorder %s589_s13, 9 }
   0x6   : > { %s704_s14 = smov (%p22_p0, %s21_s14), 0  ;;  %s706_s15 = smov (!%p22_p0, %s24_s15), %s585_s12 }
   0x7   : > { %p134_p3 = pnand %p456_p1, %p133_p2  ;;  %p26_p4 = scmp.ge.s32.totalorder %s706_s15, 2 }
   0x8   : > { %v544_v0 = vld [vmem:[%s697_s1] sm:$0xff] (!%p134_p3)   ;;  %v545_v1 = vld [vmem:[%s697_s1 + $0x8] sm:$0xff] (!%p134_p3)   ;;  %s457_s20 = sshll.u32 (!%p134_p3), %s573_s9, 3  ;;  %p163_p5 = scmp.lt.s32.totalorder (!%p134_p3), %s577_s10, 1  ;;  %vm242_vm0 = vcmask (!%p134_p3), 1041408   ;;  %vm229_vm1 = vcmask (!%p134_p3), 293888  }
   0x9   : > { %s708_s15 = smov (%p26_p4, %s706_s15), 0  ;;  %137 = sbr.rel (%p134_p3) target bundleno = 270 (0x10e), region = 28 }
   0xa   : > { %482 = vmatprep.subr.bf16.mxu0 (!%p134_p3), %v544_v0  ;;  %496 = vmatprep.subr.bf16.mxu1 (!%p134_p3), %v544_v0  ;;  %p165_p6 = scmp.lt.s32.totalorder (!%p134_p3), %s457_s20, 31  ;;  %v546_v2 = vld [vmem:[%s697_s1 + $0x10] ss:$0 sps:$4 sm:$0x33] (!%p134_p3)   ;;  %vm311_vm2 = vcmask (!%p134_p3), 64512   ;;  %p174_p7 = scmp.lt.s32.totalorder (!%p134_p3), %s573_s9, 3 }
   0xb   : > { %483 = vmatpush3.bf16.msra.mxu0 (!%p134_p3), %v544_v0  ;;  %499 = vmatpush3.bf16.msra.mxu1 (!%p134_p3), %v544_v0  ;;  %v244_v3 = vsel (!%p134_p3), %vm242_vm0, %v546_v2, 0  ;;  %vm362_vm3 = vcmask (!%p134_p3), 1040384  }
   0xc   : > { %484 = vmatprep.subr.bf16.mxu0 (!%p134_p3), %v545_v1  ;;  %497 = vmatprep.subr.bf16.mxu1 (!%p134_p3), %v545_v1 }
   0xf   : > { %485 = vmatpush3.bf16.msra.mxu0 (!%p134_p3), %v545_v1  ;;  %500 = vmatpush3.bf16.msra.mxu1 (!%p134_p3), %v545_v1 }
  0x10   : > { %s710_s10 = smov (!%p163_p5, %s577_s10), 1  ;;  %s712_s20 = smov (!%p165_p6, %s457_s20), 31  ;;  %502 = vmatprep.subr.msk.bf16.mxu0 %vm242_vm0, %v546_v2  ;;  %503 = vmatprep.subr.msk.bf16.mxu1 %vm242_vm0, %v546_v2 }
  0x11   : > { %s458_s23 = sshll.u32 %s710_s10, 5  ;;  %s714_s9 = smov (!%p174_p7, %s573_s9), 3 }
  0x12   : > { %s168_s24 = sadd.s32 %s458_s23, %s712_s20  ;;  %s460_s29 = sshll.u32 %s710_s10, 2 }
  0x13   : > { %s459_s25 = sshll.u32 %s168_s24, 2  ;;  %487 = vmatpush3.bf16.msra.mxu0 %v244_v3  ;;  %501 = vmatpush3.bf16.msra.mxu1 %v244_v3  ;;  %s177_s30 = sadd.s32 %s460_s29, %s714_s9 }
  0x14   : > { %s170_s28 = scalar_lea.vmem %s696_s0, %s459_s25  ;;  %s461_s3 = sshll.u32 %s177_s30, 3 }
  0x15   : > { %v547_v4 = vld [vmem:[%s170_s28] sm:$0xff]   ;;  %v548_v5 = vld [vmem:[%s170_s28 + $0x8] sm:$0xff]   ;;  %v549_v6 = vld [vmem:[%s170_s28 + $0x10] sm:$0xff]   ;;  %s179_s6 = scalar_lea.vmem %s698_s2, %s461_s3 }
  0x16   : > { %488 = vmatprep.mubr.msk.bf16.mxu0 %vm229_vm1, %v547_v4  ;;  %v550_v7 = vld [vmem:[%s170_s28 + $0x18] sm:$0xff]   ;;  %492 = vmatprep.mubr.msk.bf16.mxu1 %vm229_vm1, %v549_v6 }
  0x17   : > { %489 = vmatmul.mubr.msk.bf16.vlgmr.msra.gmra.mrb[0].mxu0 %vm229_vm1, %v548_v5  ;;  %493 = vmatmul.mubr.msk.bf16.vlgmr.msra.gmra.mrb[0].mxu1 %vm229_vm1, %v550_v7 }
  0xea   : > { %v490_v8 = vpop.f32.mrb[0].mxu0  ;;  %v494_v10 = vpop.f32.mrb[0].mxu1 }
  0xeb   : > { %v280_v9 = vpop.f32.mrb[1].mxu0  ;;  %v296_v13 = vpop.f32.mrb[1].mxu1  ;;  %v335_v16 = vmul.f32 %v490_v8, %v490_v8  ;;  %v315_v21 = vsel %vm311_vm2, %v490_v8, 0.0  ;;  %v339_v39 = vmul.f32 %v494_v10, %v494_v10  ;;  %v323_v43 = vsel %vm311_vm2, %v494_v10, 0.0 }
  0xec   : > { %v333_v11 = vmul.f32 %v280_v9, %v280_v9  ;;  %v491_v12 = vpop.f32.mrb[2].mxu0  ;;  %v495_v15 = vpop.f32.mrb[2].mxu1  ;;  %v312_v17 = vsel %vm311_vm2, %v280_v9, 0.0  ;;  %v337_v26 = vmul.f32 %v296_v13, %v296_v13  ;;  %v319_v31 = vsel %vm311_vm2, %v296_v13, 0.0 }
  0xed   : > { %v283_v14 = vpop.f32.mrb[3].mxu0  ;;  %v299_v20 = vpop.f32.mrb[3].mxu1  ;;  %v336_v24 = vmul.f32 %v491_v12, %v491_v12  ;;  %v344_v29 = vsel %vm311_vm2, %v335_v16, 0.0  ;;  %v317_v30 = vsel %vm311_vm2, %v491_v12, 0.0  ;;  %v340_v44 = vmul.f32 %v495_v15, %v495_v15 }
  0xee   : > { %v313_v18 = vsel %vm311_vm2, %v283_v14, 0.0  ;;  %v334_v19 = vmul.f32 %v283_v14, %v283_v14  ;;  %v341_v23 = vsel %vm311_vm2, %v333_v11, 0.0  ;;  %v348_v35 = vsel %vm311_vm2, %v337_v26, 0.0 }
  0xef   : > { %v314_v22 = vadd.f32 %v313_v18, %v312_v17  ;;  %v346_v34 = vsel %vm311_vm2, %v336_v24, 0.0  ;;  %v338_v36 = vmul.f32 %v299_v20, %v299_v20  ;;  %v321_v40 = vsel %vm311_vm2, %v299_v20, 0.0 }
  0xf0   : > { %v342_v25 = vsel %vm311_vm2, %v334_v19, 0.0  ;;  %v352_v48 = vsel %vm311_vm2, %v339_v39, 0.0  ;;  %v325_v49 = vsel %vm311_vm2, %v495_v15, 0.0  ;;  %v354_v52 = vsel %vm311_vm2, %v340_v44, 0.0 }
  0xf1   : > { %v316_v27 = vadd.f32 %v315_v21, %v314_v22  ;;  %v343_v28 = vadd.f32 %v342_v25, %v341_v23  ;;  %v350_v45 = vsel %vm311_vm2, %v338_v36, 0.0 }
  0xf3   : > { %v345_v32 = vadd.f32 %v344_v29, %v343_v28  ;;  %v318_v33 = vadd.f32 %v317_v30, %v316_v27 }
  0xf5   : > { %v320_v37 = vadd.f32 %v319_v31, %v318_v33  ;;  %v347_v38 = vadd.f32 %v346_v34, %v345_v32 }
  0xf7   : > { %v349_v41 = vadd.f32 %v348_v35, %v347_v38  ;;  %v322_v42 = vadd.f32 %v321_v40, %v320_v37 }
  0xf9   : > { %v324_v46 = vadd.f32 %v323_v43, %v322_v42  ;;  %v351_v47 = vadd.f32 %v350_v45, %v349_v41 }
  0xfb   : > { %v326_v50 = vadd.f32 %v325_v49, %v324_v46  ;;  %v353_v51 = vadd.f32 %v352_v48, %v351_v47 }
  0xfd   : > { %v327_v53 = vrot.slane %v326_v50, 4  ;;  %v355_v54 = vadd.f32 %v354_v52, %v353_v51 }
  0xff   : > { %v328_v55 = vadd.f32 %v327_v53, %v326_v50  ;;  %v356_v56 = vrot.slane %v355_v54, 4 }
 0x101   : > { %v329_v57 = vrot.slane %v328_v55, 2  ;;  %v357_v58 = vadd.f32 %v356_v56, %v355_v54 }
 0x103   : > { %v330_v59 = vadd.f32 %v329_v57, %v328_v55  ;;  %v358_v60 = vrot.slane %v357_v58, 2 }
 0x105   : > { %v331_v61 = vrot.slane %v330_v59, 1  ;;  %v359_v62 = vadd.f32 %v358_v60, %v357_v58 }
 0x107   : > { %v360_v63 = vrot.slane %v359_v62, 1  ;;  %v332_v0 = vadd.f32 %v331_v61, %v330_v59 }
 0x109   : > { %v361_v1 = vadd.f32 %v360_v63, %v359_v62 }
 0x10b   : > { %v363_v2 = vsel %vm362_vm3, %v332_v0, %v361_v1 }
 0x10c   : > { %v364_v3 = vsel %vm242_vm0, %v363_v2, 0.0 }
 0x10d   : > { %365 = vst.msk [vmem:[%s179_s6] sm:$0xff] %vm311_vm2, %v364_v3 }
 0x10e PF: > { %s12_s13 = sadd.s32 1, %s589_s13   ;;  %s699_s9 = smov %s581_s11 }
 0x10f   : > { %p9_p8 = scmp.ge.s32.totalorder %s12_s13, 10   ;;  %s700_s10 = smov %s585_s12 }
 0x110   : > { %s701_s11 = smov %s704_s14  ;;  %s702_s12 = smov %s708_s15 }
 0x111   :  { %11 = sbr.rel (!%p9_p8) target bundleno = 3 (0x3), region = 58 }

// kernel: cnn_layer_forward.3
= control target key start
LH: loop header
LB: loop body
LE: loop exit
PB: predicated region body
PF: predicated region fallthrough
CT: control target
= control target key end

     0   :  { %s895_s15 = smov 0   ;;  %s897_s16 = smov 0   ;;  %s1008_s0 = inlined_call_operand.vmem [shape: bf16[2,4,64,36], index: 0, kind: input, shape index: {}]   ;;  %s1009_s1 = inlined_call_operand.vmem [shape: bf16[36,8], index: 1, kind: input, shape index: {}]   ;;  %s1010_s2 = inlined_call_operand.vmem [shape: f32[1,8], index: 2, kind: input, shape index: {}]   ;;  %s1011_s3 = inlined_call_operand.vmem [shape: f32[1,8], index: 3, kind: input, shape index: {}]   ;;  %s1012_s4 = inlined_call_operand.vmem [shape: f32[2,64,8], index: 4, kind: output, shape index: {}]  }
   0x1   :  { %s899_s17 = smov 0   ;;  %s901_s18 = smov 0  }
   0x2   :  { %s903_s19 = smov 0   ;;  %s905_s20 = smov 0  }
   0x3   :  { %s907_s21 = smov 0  }
   0x4 LB: > { %s23_s22 = sadd.s32 1, %s858_s19  ;;  %s26_s23 = sadd.s32 1, %s862_s20  ;;  %s866_s21 = sphi %s907_s21, %s14_s21   ;;  %s862_s20 = sphi %s905_s20, %s1018_s20   ;;  %s858_s19 = sphi %s903_s19, %s1017_s19   ;;  %s854_s18 = sphi %s901_s18, %s1016_s18   ;;  %s850_s17 = sphi %s899_s17, %s1015_s17   ;;  %s846_s16 = sphi %s897_s16, %s1014_s16   ;;  %s842_s15 = sphi %s895_s15, %s1013_s15  }
   0x5   : > { %p24_p0 = scmp.ge.s32.totalorder %s23_s22, 4  ;;  %p42_p1 = scmp.ne.s32.totalorder %s846_s16, %s842_s15 }
   0x6   : > { %p43_p2 = scmp.eq.s32.totalorder %s866_s21, 0  ;;  %s35_s27 = sadd.s32 1, %s846_s16 }
   0x7   : > { %s1020_s22 = smov (%p24_p0, %s23_s22), 0  ;;  %s1022_s23 = smov (!%p24_p0, %s26_s23), %s862_s20 }
   0x8   : > { %p44_p3 = por %p43_p2, %p42_p1  ;;  %p28_p4 = scmp.ge.s32.totalorder %s1022_s23, 2 }
   0x9   : > { %s31_s24 = ssub.s32 %s858_s19, %s1020_s22  ;;  %p660_p6 = scmp.ge.s32.totalorder %s866_s21, 8 }
   0xa   : > { %s1024_s23 = smov (%p28_p4, %s1022_s23), 0 }
   0xb   : > { %s30_s25 = ssub.s32 %s862_s20, %s1024_s23  ;;  %168 = sbr.rel (%p660_p6) target bundleno = 29 (0x1d), region = 28 }
   0xc   : > { %s32_s26 = sor.u32 %s31_s24, %s30_s25 }
   0xd   : > { %p33_p5 = scmp.eq.s32.totalorder %s32_s26, 0 }
   0xf   : > { %s946_s28 = scalar_select %p33_p5, %s846_s16, %s35_s27  }
  0x12   : > { %171 = sbr.rel (!%p44_p3) target bundleno = 29 (0x1d), region = 32  ;;  %s173_s29 = sand.u32 (%p44_p3), 1, %s846_s16  }
  0x13   : > { %s662_s30 = sshll.u32 (%p44_p3), %s858_s19, 1  ;;  %s661_s5 = sshll.u32 (%p44_p3), %s173_s29, 5 }
  0x14   : > { %s663_s6 = sshll.u32 (%p44_p3), %s862_s20, 5  ;;  %s175_s12 = scalar_lea.vmem (%p44_p3), [#allocation2], %s661_s5 }
  0x15   : > { %s178_s7 = sadd.s32 (%p44_p3), %s663_s6, %s662_s30 }
  0x16   : > { %s664_s8 = sshll.u32 (%p44_p3), %s178_s7, 2 }
  0x17   : > { %s180_s11 = scalar_lea.vmem (%p44_p3), %s1008_s0, %s664_s8 }
  0x18   : > { %v196_v0 = vld [vmem:[%s180_s11] sm:$0xff] (%p44_p3)  }
  0x19   : > { %v200_v1 = vld [vmem:[%s180_s11 + $0x20] sm:$0xff]   ;;  %197 = vst [vmem:[%s175_s12] sm:$0xff] %v196_v0  }
  0x1a   : > { %v204_v2 = vld [vmem:[%s180_s11 + $0x40] sm:$0xff]   ;;  %201 = vst [vmem:[%s175_s12 + $0x8] sm:$0xff] %v200_v1  }
  0x1b   : > { %205 = vst [vmem:[%s175_s12 + $0x10] sm:$0xff] %v204_v2   ;;  %v208_v3 = vld [vmem:[%s180_s11 + $0x60] sm:$0xff]  }
  0x1c   : > { %209 = vst [vmem:[%s175_s12 + $0x18] sm:$0xff] %v208_v3  }
  0x1d PF: > { %p665_p7 = scmp.ge.s32.totalorder %s866_s21, 1  ;;  %p249_p8 = scmp.lt.s32.totalorder %s866_s21, 9 }
  0x1f   : > { %p250_p9 = pnand %p665_p7, %p249_p8 }
  0x20   : > { %v805_v4 = vld [vmem:[%s1009_s1] sm:$0xff] (!%p250_p9)   ;;  %v868_v5 = vmov (!%p250_p9), 0.0   ;;  %v806_v6 = vld [vmem:[%s1009_s1 + $0x8] sm:$0xff] (!%p250_p9)   ;;  %v807_v7 = vld [vmem:[%s1009_s1 + $0x10] ss:$0 sps:$4 sm:$0x33] (!%p250_p9)  }
  0x21   : > { %253 = sbr.rel (%p250_p9) target bundleno = 282 (0x11a), region = 73  ;;  %707 = vmatprep.subr.bf16.mxu0 (!%p250_p9), %v868_v5  ;;  %717 = vmatprep.subr.bf16.mxu1 (!%p250_p9), %v868_v5  ;;  %s256_s29 = sand.u32 (!%p250_p9), 1, %s842_s15   ;;  %vm329_vm0 = vcmask (!%p250_p9), 1041408   ;;  %vm869_vm1 = vmmov (!%p250_p9), 0   ;;  %vm325_vm2 = vcmask (!%p250_p9), 293888   ;;  %vm561_vm3 = vcmask (!%p250_p9), 64512  }
  0x22   : > { %708 = vmatpush3.bf16.msra.mxu0 (!%p250_p9), %v805_v4  ;;  %718 = vmatpush3.bf16.msra.mxu1 (!%p250_p9), %v805_v4  ;;  %s666_s30 = sshll.u32 (!%p250_p9), %s256_s29, 5  ;;  %v331_v8 = vsel (!%p250_p9), %vm329_vm0, %v807_v7, 0  ;;  %v675_v13 = vld [vmem:[%s1010_s2] ss:$0 sm:$0xff] (!%p250_p9)  ;;  %s667_s7 = sshll.u32 (!%p250_p9), %s850_s17, 1 }
  0x23   : > { %709 = vmatprep.subr.bf16.mxu0 (!%p250_p9), %v868_v5  ;;  %719 = vmatprep.subr.bf16.mxu1 (!%p250_p9), %v868_v5  ;;  %s258_s5 = scalar_lea.vmem (!%p250_p9), [#allocation2], %s666_s30  ;;  %p287_p10 = scmp.lt.s32.totalorder (!%p250_p9), %s854_s18, 1  ;;  %v688_v41 = vld [vmem:[%s1011_s3] ss:$0 sm:$0xff] (!%p250_p9) }
  0x24   : > { %713 = vmatprep.mubr.msk.bf16.mxu0 (!%p250_p9), %vm869_vm1, %v868_v5  ;;  %723 = vmatprep.mubr.msk.bf16.mxu1 (!%p250_p9), %vm869_vm1, %v868_v5  ;;  %v808_v9 = vld [vmem:[%s258_s5] sm:$0xff] (!%p250_p9)   ;;  %v809_v10 = vld [vmem:[%s258_s5 + $0x8] sm:$0xff] (!%p250_p9)   ;;  %v810_v11 = vld [vmem:[%s258_s5 + $0x10] sm:$0xff] (!%p250_p9)   ;;  %p289_p11 = scmp.lt.s32.totalorder (!%p250_p9), %s667_s7, 7 }
  0x25   : > { %v811_v12 = vld [vmem:[%s258_s5 + $0x18] sm:$0xff] (!%p250_p9)  }
  0x26   : > { %710 = vmatpush3.bf16.msra.mxu0 (!%p250_p9), %v806_v6  ;;  %720 = vmatpush3.bf16.msra.mxu1 (!%p250_p9), %v806_v6 }
  0x27   : > { %711 = vmatprep.subr.bf16.mxu0 (!%p250_p9), %v868_v5  ;;  %721 = vmatprep.subr.bf16.mxu1 (!%p250_p9), %v868_v5 }
  0x28   : > { %s1026_s18 = smov (!%p287_p10, %s854_s18), 1  ;;  %s1028_s7 = smov (!%p289_p11, %s667_s7), 7 }
  0x29   : > { %s668_s8 = sshll.u32 %s1026_s18, 3 }
  0x2a   : > { %712 = vmatpush3.bf16.msra.mxu0 %v331_v8  ;;  %722 = vmatpush3.bf16.msra.mxu1 %v331_v8  ;;  %s292_s9 = sadd.s32 %s668_s8, %s1028_s7 }
  0x2b   : > { %727 = vmatprep.subr.bf16.mxu0 %v868_v5  ;;  %737 = vmatprep.subr.bf16.mxu1 %v868_v5  ;;  %s669_s11 = sshll.u32 %s292_s9, 3 }
  0x2c   : > { %s294_s13 = scalar_lea.vmem %s1012_s4, %s669_s11 }
  0x2d   : > { %714 = vmatmul.mubr.msk.bf16.vlgmr.msra.gmra.mrb[0].mxu0 %vm325_vm2, %v808_v9  ;;  %724 = vmatmul.mubr.msk.bf16.vlgmr.msra.gmra.mrb[0].mxu1 %vm325_vm2, %v809_v10 }
  0x2e   : > { %728 = vmatpush3.bf16.msra.mxu0 %v805_v4  ;;  %738 = vmatpush3.bf16.msra.mxu1 %v805_v4 }
  0x2f   : > { %729 = vmatprep.subr.bf16.mxu0 %v868_v5  ;;  %739 = vmatprep.subr.bf16.mxu1 %v868_v5 }
  0x30   : > { %733 = vmatprep.mubr.msk.bf16.mxu0 %vm869_vm1, %v868_v5  ;;  %743 = vmatprep.mubr.msk.bf16.mxu1 %vm869_vm1, %v868_v5 }
  0x32   : > { %730 = vmatpush3.bf16.msra.mxu0 %v806_v6  ;;  %740 = vmatpush3.bf16.msra.mxu1 %v806_v6 }
  0x33   : > { %731 = vmatprep.subr.bf16.mxu0 %v868_v5  ;;  %741 = vmatprep.subr.bf16.mxu1 %v868_v5 }
  0x36   : > { %732 = vmatpush3.bf16.msra.mxu0 %v331_v8  ;;  %742 = vmatpush3.bf16.msra.mxu1 %v331_v8 }
  0x39   : > { %734 = vmatmul.mubr.msk.bf16.vlgmr.msra.gmra.mrb[4].mxu0 %vm325_vm2, %v810_v11  ;;  %744 = vmatmul.mubr.msk.bf16.vlgmr.msra.gmra.mrb[4].mxu1 %vm325_vm2, %v811_v12 }
 0x100   : > { %v367_v14 = vpop.f32.mrb[0].mxu0  ;;  %v427_v15 = vpop.f32.mrb[0].mxu1 }
 0x101   : > { %v380_v16 = vmul.f32 %v675_v13, %v367_v14  ;;  %v434_v17 = vmul.f32 %v675_v13, %v427_v15  ;;  %v715_v18 = vpop.f32.mrb[1].mxu0  ;;  %v725_v19 = vpop.f32.mrb[1].mxu1 }
 0x102   : > { %v370_v20 = vpop.f32.mrb[2].mxu0  ;;  %v430_v21 = vpop.f32.mrb[2].mxu1 }
 0x103   : > { %v436_v22 = vmax.f32 %v380_v16, %v434_v17  ;;  %v381_v23 = vmul.f32 %v675_v13, %v370_v20  ;;  %v435_v24 = vmul.f32 %v675_v13, %v430_v21  ;;  %v716_v25 = vpop.f32.mrb[3].mxu0  ;;  %v726_v26 = vpop.f32.mrb[3].mxu1 }
 0x105   : > { %v437_v27 = vmax.f32 %v381_v23, %v435_v24 }
 0x10c   : > { %v483_v28 = vpop.f32.mrb[4].mxu0  ;;  %v537_v29 = vpop.f32.mrb[4].mxu1 }
 0x10d   : > { %v490_v30 = vmul.f32 %v675_v13, %v483_v28  ;;  %v544_v31 = vmul.f32 %v675_v13, %v537_v29  ;;  %v735_v32 = vpop.f32.mrb[5].mxu0  ;;  %v745_v33 = vpop.f32.mrb[5].mxu1 }
 0x10e   : > { %v486_v34 = vpop.f32.mrb[6].mxu0  ;;  %v540_v35 = vpop.f32.mrb[6].mxu1 }
 0x10f   : > { %v546_v36 = vmax.f32 %v490_v30, %v544_v31  ;;  %v491_v37 = vmul.f32 %v675_v13, %v486_v34  ;;  %v545_v38 = vmul.f32 %v675_v13, %v540_v35  ;;  %v736_v39 = vpop.f32.mrb[7].mxu0  ;;  %v746_v40 = vpop.f32.mrb[7].mxu1 }
 0x111   : > { %v548_v42 = vmax.f32 %v436_v22, %v546_v36  ;;  %v547_v43 = vmax.f32 %v491_v37, %v545_v38 }
 0x113   : > { %v557_v44 = vadd.f32 %v688_v41, %v548_v42  ;;  %v549_v45 = vmax.f32 %v437_v27, %v547_v43 }
 0x115   : > { %v559_v46 = vmax.f32 %v557_v44, 0.0  ;;  %v558_v47 = vadd.f32 %v688_v41, %v549_v45 }
 0x117   : > { %562 = vst.msk [vmem:[%s294_s13] sm:$0xff] %vm561_vm3, %v559_v46  ;;  %v560_v48 = vmax.f32 %v558_v47, 0.0 }
 0x119   : > { %563 = vst.msk [vmem:[%s294_s13 + $0x8] sm:$0xff] %vm561_vm3, %v560_v48 }
 0x11a PF: > { %s14_s21 = sadd.s32 1, %s866_s21   ;;  %s1013_s15 = smov %s846_s16 }
 0x11b   : > { %p11_p12 = scmp.ge.s32.totalorder %s14_s21, 10   ;;  %s1014_s16 = smov %s946_s28 }
 0x11c   : > { %s1015_s17 = smov %s858_s19  ;;  %s1016_s18 = smov %s862_s20 }
 0x11d   : > { %s1017_s19 = smov %s1020_s22  ;;  %s1018_s20 = smov %s1024_s23 }
 0x11e   :  { %13 = sbr.rel (!%p11_p12) target bundleno = 4 (0x4), region = 115 }

</bundles_post_ra>
